<compile_context>
chip_gen: v5e
topology: v5e:2x2
jax: 0.10.0
libtpu: 0.0.40
codegen_flags: <defaults>
</compile_context>

<pallas_src>
import jax
import jax.numpy as jnp
from jax import lax
from jax.experimental import pallas as pl
from jax.experimental.pallas import tpu as pltpu


def _make_crop_kernel(H, W, Ht, Wt, start_h, start_w, Bt):
    # align_corners=True unnormalization folded into compile-time constants:
    #   p_x = j + start_w + x + (-(W//2) + (W-1)/2)   (extra term is 0 for odd W)
    x_const = float(start_w) + float(-(W // 2) + (W - 1) / 2.0)
    y_const = float(start_h) + float(-(H // 2) + (H - 1) / 2.0)

    def kernel(coords_ref, inp_ref, out_ref):
        g = pl.program_id(0)  # batch-tile index

        # ---- batch-invariant grids, hoisted out of the per-batch loop ----
        # Width weights are built directly in (W, Wt) orientation (pre-
        # transposed) so the second matmul contracts over the RHS first dim.
        w_idx = lax.broadcasted_iota(jnp.int32, (W, Wt), 0)                    # map col index
        px_base = (lax.broadcasted_iota(jnp.int32, (W, Wt), 1)
                   .astype(jnp.float32) + x_const)                             # output col j
        # Height weights in (Ht, H).
        h_idx = lax.broadcasted_iota(jnp.int32, (Ht, H), 1)                    # map row index
        py_base = (lax.broadcasted_iota(jnp.int32, (Ht, H), 0)
                   .astype(jnp.float32) + y_const)                             # output row i

        def body(bi, carry):
            b = g * Bt + bi
            x = coords_ref[2 * b].astype(jnp.float32)      # scalar (SMEM), cast in-kernel
            y = coords_ref[2 * b + 1].astype(jnp.float32)
            inp = inp_ref[bi].astype(jnp.float32)          # (H, W), int->f32 cast in-kernel

            # -- width (column) bilinear weights: (W, Wt), pre-transposed --
            px = px_base + x
            x0 = jnp.floor(px)
            fx = px - x0
            x0i = x0.astype(jnp.int32)                     # robust int compare
            # zeros padding: out-of-range corners never match an index in [0, W)
            wx = (jnp.where(w_idx == x0i, 1.0 - fx, 0.0)
                  + jnp.where(w_idx == x0i + 1, fx, 0.0))

            # -- height (row) bilinear weights: (Ht, H) --
            py = py_base + y
            y0 = jnp.floor(py)
            fy = py - y0
            y0i = y0.astype(jnp.int32)
            wy = (jnp.where(h_idx == y0i, 1.0 - fy, 0.0)
                  + jnp.where(h_idx == y0i + 1, fy, 0.0))

            # -- separable bilinear grid_sample: Wy @ inp @ Wx (MXU) --
            tmp = jnp.dot(wy, inp, preferred_element_type=jnp.float32)   # (Ht, W)
            res = jnp.dot(tmp, wx, preferred_element_type=jnp.float32)   # (Ht, Wt)

            out_ref[bi] = jnp.round(res).astype(jnp.int32)
            return carry

        lax.fori_loop(0, Bt, body, None, unroll=True)

    return kernel


def _pick_batch_tile(B, cap=32):
    """Largest divisor of B not exceeding `cap` (keeps grid steps few, VMEM tiny)."""
    bt = min(B, cap)
    while B % bt != 0:
        bt -= 1
    return bt


def crop(inputs, coordinates, height_target, width_target, batch_tile=None):
    """Pallas equivalent of Crop.forward.

    inputs:      [B, H, W] (any numeric dtype; cast to float32 inside the kernel)
    coordinates: [B, 2] (x, y), integer or float
    returns:     [B, height_target, width_target] int32
    """
    B, H, W = inputs.shape
    Ht, Wt = height_target, width_target
    # torch: arange(-num_steps // 2, num_steps // 2)  (Python floor division)
    start_h = (-Ht) // 2
    start_w = (-Wt) // 2

    Bt = batch_tile if batch_tile is not None else _pick_batch_tile(B)
    assert B % Bt == 0, "batch_tile must divide batch size"
    kernel = _make_crop_kernel(H, W, Ht, Wt, start_h, start_w, Bt)

    # 1-D coordinate table for SMEM (2-D [B,2] SMEM would pad to [8,128] words).
    coords_flat = coordinates.reshape(2 * B)
    if jnp.issubdtype(coords_flat.dtype, jnp.floating):
        coords_flat = coords_flat.astype(jnp.float32)
    else:
        coords_flat = coords_flat.astype(jnp.int32)

    return pl.pallas_call(
        kernel,
        out_shape=jax.ShapeDtypeStruct((B, Ht, Wt), jnp.int32),
        grid=(B // Bt,),
        in_specs=[
            # whole flattened coordinate table lives in SMEM (scalar reads)
            pl.BlockSpec(memory_space=pltpu.MemorySpace.SMEM),
            # Bt full H x W maps per grid step in VMEM (original dtype, cast in-kernel)
            pl.BlockSpec((Bt, H, W), lambda g: (g, 0, 0)),
        ],
        out_specs=pl.BlockSpec((Bt, Ht, Wt), lambda g: (g, 0, 0)),
        compiler_params=pltpu.CompilerParams(
            dimension_semantics=("parallel",)),
    )(coords_flat, inputs)


if __name__ == "__main__":
    key = jax.random.PRNGKey(0)
    B, H, W = 4, 21, 79     # NetHack-like dungeon map (height=21, width=79)
    Ht, Wt = 9, 9           # egocentric crop target

    k1, k2, k3 = jax.random.split(key, 3)
    glyphs = jax.random.randint(k1, (B, H, W), 0, 128, dtype=jnp.int32)
    xs = jax.random.randint(k2, (B,), 0, W, dtype=jnp.int32)
    ys = jax.random.randint(k3, (B,), 0, H, dtype=jnp.int32)
    coords = jnp.stack([xs, ys], axis=1)   # (B, 2), columns = (x, y)

    out = jax.block_until_ready(crop(glyphs, coords, Ht, Wt))
    assert out.shape == (B, Ht, Wt) and out.dtype == jnp.int32

    # Independent reference: for odd H, W and integer coordinates the crop is
    # exactly a zero-padded window centered (with floor-div offset) at (x, y).
    start_h, start_w = (-Ht) // 2, (-Wt) // 2
    ii = jnp.arange(Ht)[None, :, None]
    jj = jnp.arange(Wt)[None, None, :]
    rows = coords[:, 1][:, None, None] + start_h + ii
    cols = coords[:, 0][:, None, None] + start_w + jj
    valid = (rows >= 0) & (rows < H) & (cols >= 0) & (cols < W)
    gathered = glyphs[jnp.arange(B)[:, None, None],
                      jnp.clip(rows, 0, H - 1),
                      jnp.clip(cols, 0, W - 1)]
    ref = jnp.where(valid, gathered, 0)

    assert jnp.array_equal(out, ref), "Pallas crop mismatch vs reference window"
    print("KERNEL_OK")
</pallas_src>

<mosaic_0001>
module attributes {stable_mosaic.version = 11 : i64} {
  func.func @kernel(%arg0: i32, %arg1: memref<8xi32, #tpu.memory_space<smem>>, %arg2: memref<4x21x79xi32, #tpu.memory_space<vmem>>, %arg3: memref<4x9x9xi32, #tpu.memory_space<vmem>>) attributes {dimension_semantics = [#tpu.dimension_semantics<parallel>], iteration_bounds = array<i64: 1>, scalar_prefetch = 0 : i64, scratch_operands = 0 : i64, tpu.core_type = #tpu.core_type<tc>, window_params = [{transform_indices = @transform_0, window_bounds = array<i64: 8>}, {transform_indices = @transform_1, window_bounds = array<i64: 4, 21, 79>}, {transform_indices = @transform_2, window_bounds = array<i64: 4, 9, 9>}]} {
    %0 = tpu.iota {dimensions = array<i32: 0>} : vector<79x9xi32>
    %1 = tpu.iota {dimensions = array<i32: 1>} : vector<79x9xi32>
    %2 = arith.sitofp %1 : vector<79x9xi32> to vector<79x9xf32>
    %cst = arith.constant -5.000000e+00 : f32
    %3 = vector.broadcast %cst : f32 to vector<79x9xf32>
    %4 = arith.addf %2, %3 : vector<79x9xf32>
    %5 = tpu.iota {dimensions = array<i32: 1>} : vector<9x21xi32>
    %6 = tpu.iota {dimensions = array<i32: 0>} : vector<9x21xi32>
    %7 = arith.sitofp %6 : vector<9x21xi32> to vector<9x21xf32>
    %cst_0 = arith.constant -5.000000e+00 : f32
    %8 = vector.broadcast %cst_0 : f32 to vector<9x21xf32>
    %9 = arith.addf %7, %8 : vector<9x21xf32>
    %c0_i32 = arith.constant 0 : i32
    %c4_i32 = arith.constant 4 : i32
    %10 = arith.muli %arg0, %c4_i32 : i32
    %11 = arith.addi %10, %c0_i32 : i32
    %c2_i32 = arith.constant 2 : i32
    %12 = arith.muli %c2_i32, %11 : i32
    %13 = arith.index_cast %12 : i32 to index
    %14 = memref.load %arg1[%13] : memref<8xi32, #tpu.memory_space<smem>>
    %15 = arith.sitofp %14 : i32 to f32
    %c2_i32_1 = arith.constant 2 : i32
    %16 = arith.muli %c2_i32_1, %11 : i32
    %c1_i32 = arith.constant 1 : i32
    %17 = arith.addi %16, %c1_i32 : i32
    %18 = arith.index_cast %17 : i32 to index
    %19 = memref.load %arg1[%18] : memref<8xi32, #tpu.memory_space<smem>>
    %20 = arith.sitofp %19 : i32 to f32
    %21 = arith.index_cast %c0_i32 : i32 to index
    %c0 = arith.constant 0 : index
    %c0_2 = arith.constant 0 : index
    %22 = vector.load %arg2[%21, %c0, %c0_2] : memref<4x21x79xi32, #tpu.memory_space<vmem>>, vector<1x21x79xi32>
    %23 = vector.shape_cast %22 : vector<1x21x79xi32> to vector<21x79xi32>
    %24 = arith.sitofp %23 : vector<21x79xi32> to vector<21x79xf32>
    %25 = vector.broadcast %15 : f32 to vector<79x9xf32>
    %26 = arith.addf %4, %25 : vector<79x9xf32>
    %27 = math.floor %26 : vector<79x9xf32>
    %28 = arith.subf %26, %27 : vector<79x9xf32>
    %29 = arith.fptosi %27 : vector<79x9xf32> to vector<79x9xi32>
    %30 = arith.cmpi eq, %0, %29 : vector<79x9xi32>
    %cst_3 = arith.constant 1.000000e+00 : f32
    %31 = vector.broadcast %cst_3 : f32 to vector<79x9xf32>
    %32 = arith.subf %31, %28 : vector<79x9xf32>
    %cst_4 = arith.constant 0.000000e+00 : f32
    %33 = vector.broadcast %cst_4 : f32 to vector<79x9xf32>
    %34 = arith.select %30, %32, %33 : vector<79x9xi1>, vector<79x9xf32>
    %c1_i32_5 = arith.constant 1 : i32
    %35 = vector.broadcast %c1_i32_5 : i32 to vector<79x9xi32>
    %36 = arith.addi %29, %35 : vector<79x9xi32>
    %37 = arith.cmpi eq, %0, %36 : vector<79x9xi32>
    %cst_6 = arith.constant 0.000000e+00 : f32
    %38 = vector.broadcast %cst_6 : f32 to vector<79x9xf32>
    %39 = arith.select %37, %28, %38 : vector<79x9xi1>, vector<79x9xf32>
    %40 = arith.addf %34, %39 : vector<79x9xf32>
    %41 = vector.broadcast %20 : f32 to vector<9x21xf32>
    %42 = arith.addf %9, %41 : vector<9x21xf32>
    %43 = math.floor %42 : vector<9x21xf32>
    %44 = arith.subf %42, %43 : vector<9x21xf32>
    %45 = arith.fptosi %43 : vector<9x21xf32> to vector<9x21xi32>
    %46 = arith.cmpi eq, %5, %45 : vector<9x21xi32>
    %cst_7 = arith.constant 1.000000e+00 : f32
    %47 = vector.broadcast %cst_7 : f32 to vector<9x21xf32>
    %48 = arith.subf %47, %44 : vector<9x21xf32>
    %cst_8 = arith.constant 0.000000e+00 : f32
    %49 = vector.broadcast %cst_8 : f32 to vector<9x21xf32>
    %50 = arith.select %46, %48, %49 : vector<9x21xi1>, vector<9x21xf32>
    %c1_i32_9 = arith.constant 1 : i32
    %51 = vector.broadcast %c1_i32_9 : i32 to vector<9x21xi32>
    %52 = arith.addi %45, %51 : vector<9x21xi32>
    %53 = arith.cmpi eq, %5, %52 : vector<9x21xi32>
    %cst_10 = arith.constant 0.000000e+00 : f32
    %54 = vector.broadcast %cst_10 : f32 to vector<9x21xf32>
    %55 = arith.select %53, %44, %54 : vector<9x21xi1>, vector<9x21xf32>
    %56 = arith.addf %50, %55 : vector<9x21xf32>
    %cst_11 = arith.constant dense<0.000000e+00> : vector<9x79xf32>
    %57 = tpu.matmul %56, %24, %cst_11 {dimension_numbers = #tpu.dot_dimension_numbers<[1], [0], [0], [1], [0, 0, 1, 1], [], []>} : vector<9x21xf32>, vector<21x79xf32>, vector<9x79xf32> -> vector<9x79xf32>
    %cst_12 = arith.constant dense<0.000000e+00> : vector<9x9xf32>
    %58 = tpu.matmul %57, %40, %cst_12 {dimension_numbers = #tpu.dot_dimension_numbers<[1], [0], [0], [1], [0, 0, 1, 1], [], []>} : vector<9x79xf32>, vector<79x9xf32>, vector<9x9xf32> -> vector<9x9xf32>
    %59 = math.roundeven %58 : vector<9x9xf32>
    %60 = arith.fptosi %59 : vector<9x9xf32> to vector<9x9xi32>
    %61 = arith.index_cast %c0_i32 : i32 to index
    %c0_13 = arith.constant 0 : index
    %c0_14 = arith.constant 0 : index
    %62 = vector.load %arg3[%61, %c0_13, %c0_14] : memref<4x9x9xi32, #tpu.memory_space<vmem>>, vector<1x9x9xi32>
    %63 = vector.shape_cast %62 : vector<1x9x9xi32> to vector<9x9xi32>
    %64 = vector.shape_cast %60 : vector<9x9xi32> to vector<1x9x9xi32>
    tpu.vector_store %arg3[%61, %c0_13, %c0_14], %64 {strides = array<i32>} : memref<4x9x9xi32, #tpu.memory_space<vmem>>, vector<1x9x9xi32>,
    %c1_i32_15 = arith.constant 1 : i32
    %c4_i32_16 = arith.constant 4 : i32
    %65 = arith.muli %arg0, %c4_i32_16 : i32
    %66 = arith.addi %65, %c1_i32_15 : i32
    %c2_i32_17 = arith.constant 2 : i32
    %67 = arith.muli %c2_i32_17, %66 : i32
    %68 = arith.index_cast %67 : i32 to index
    %69 = memref.load %arg1[%68] : memref<8xi32, #tpu.memory_space<smem>>
    %70 = arith.sitofp %69 : i32 to f32
    %c2_i32_18 = arith.constant 2 : i32
    %71 = arith.muli %c2_i32_18, %66 : i32
    %c1_i32_19 = arith.constant 1 : i32
    %72 = arith.addi %71, %c1_i32_19 : i32
    %73 = arith.index_cast %72 : i32 to index
    %74 = memref.load %arg1[%73] : memref<8xi32, #tpu.memory_space<smem>>
    %75 = arith.sitofp %74 : i32 to f32
    %76 = arith.index_cast %c1_i32_15 : i32 to index
    %c0_20 = arith.constant 0 : index
    %c0_21 = arith.constant 0 : index
    %77 = vector.load %arg2[%76, %c0_20, %c0_21] : memref<4x21x79xi32, #tpu.memory_space<vmem>>, vector<1x21x79xi32>
    %78 = vector.shape_cast %77 : vector<1x21x79xi32> to vector<21x79xi32>
    %79 = arith.sitofp %78 : vector<21x79xi32> to vector<21x79xf32>
    %80 = vector.broadcast %70 : f32 to vector<79x9xf32>
    %81 = arith.addf %4, %80 : vector<79x9xf32>
    %82 = math.floor %81 : vector<79x9xf32>
    %83 = arith.subf %81, %82 : vector<79x9xf32>
    %84 = arith.fptosi %82 : vector<79x9xf32> to vector<79x9xi32>
    %85 = arith.cmpi eq, %0, %84 : vector<79x9xi32>
    %cst_22 = arith.constant 1.000000e+00 : f32
    %86 = vector.broadcast %cst_22 : f32 to vector<79x9xf32>
    %87 = arith.subf %86, %83 : vector<79x9xf32>
    %cst_23 = arith.constant 0.000000e+00 : f32
    %88 = vector.broadcast %cst_23 : f32 to vector<79x9xf32>
    %89 = arith.select %85, %87, %88 : vector<79x9xi1>, vector<79x9xf32>
    %c1_i32_24 = arith.constant 1 : i32
    %90 = vector.broadcast %c1_i32_24 : i32 to vector<79x9xi32>
    %91 = arith.addi %84, %90 : vector<79x9xi32>
    %92 = arith.cmpi eq, %0, %91 : vector<79x9xi32>
    %cst_25 = arith.constant 0.000000e+00 : f32
    %93 = vector.broadcast %cst_25 : f32 to vector<79x9xf32>
    %94 = arith.select %92, %83, %93 : vector<79x9xi1>, vector<79x9xf32>
    %95 = arith.addf %89, %94 : vector<79x9xf32>
    %96 = vector.broadcast %75 : f32 to vector<9x21xf32>
    %97 = arith.addf %9, %96 : vector<9x21xf32>
    %98 = math.floor %97 : vector<9x21xf32>
    %99 = arith.subf %97, %98 : vector<9x21xf32>
    %100 = arith.fptosi %98 : vector<9x21xf32> to vector<9x21xi32>
    %101 = arith.cmpi eq, %5, %100 : vector<9x21xi32>
    %cst_26 = arith.constant 1.000000e+00 : f32
    %102 = vector.broadcast %cst_26 : f32 to vector<9x21xf32>
    %103 = arith.subf %102, %99 : vector<9x21xf32>
    %cst_27 = arith.constant 0.000000e+00 : f32
    %104 = vector.broadcast %cst_27 : f32 to vector<9x21xf32>
    %105 = arith.select %101, %103, %104 : vector<9x21xi1>, vector<9x21xf32>
    %c1_i32_28 = arith.constant 1 : i32
    %106 = vector.broadcast %c1_i32_28 : i32 to vector<9x21xi32>
    %107 = arith.addi %100, %106 : vector<9x21xi32>
    %108 = arith.cmpi eq, %5, %107 : vector<9x21xi32>
    %cst_29 = arith.constant 0.000000e+00 : f32
    %109 = vector.broadcast %cst_29 : f32 to vector<9x21xf32>
    %110 = arith.select %108, %99, %109 : vector<9x21xi1>, vector<9x21xf32>
    %111 = arith.addf %105, %110 : vector<9x21xf32>
    %cst_30 = arith.constant dense<0.000000e+00> : vector<9x79xf32>
    %112 = tpu.matmul %111, %79, %cst_30 {dimension_numbers = #tpu.dot_dimension_numbers<[1], [0], [0], [1], [0, 0, 1, 1], [], []>} : vector<9x21xf32>, vector<21x79xf32>, vector<9x79xf32> -> vector<9x79xf32>
    %cst_31 = arith.constant dense<0.000000e+00> : vector<9x9xf32>
    %113 = tpu.matmul %112, %95, %cst_31 {dimension_numbers = #tpu.dot_dimension_numbers<[1], [0], [0], [1], [0, 0, 1, 1], [], []>} : vector<9x79xf32>, vector<79x9xf32>, vector<9x9xf32> -> vector<9x9xf32>
    %114 = math.roundeven %113 : vector<9x9xf32>
    %115 = arith.fptosi %114 : vector<9x9xf32> to vector<9x9xi32>
    %116 = arith.index_cast %c1_i32_15 : i32 to index
    %c0_32 = arith.constant 0 : index
    %c0_33 = arith.constant 0 : index
    %117 = vector.load %arg3[%116, %c0_32, %c0_33] : memref<4x9x9xi32, #tpu.memory_space<vmem>>, vector<1x9x9xi32>
    %118 = vector.shape_cast %117 : vector<1x9x9xi32> to vector<9x9xi32>
    %119 = vector.shape_cast %115 : vector<9x9xi32> to vector<1x9x9xi32>
    tpu.vector_store %arg3[%116, %c0_32, %c0_33], %119 {strides = array<i32>} : memref<4x9x9xi32, #tpu.memory_space<vmem>>, vector<1x9x9xi32>,
    %c2_i32_34 = arith.constant 2 : i32
    %c4_i32_35 = arith.constant 4 : i32
    %120 = arith.muli %arg0, %c4_i32_35 : i32
    %121 = arith.addi %120, %c2_i32_34 : i32
    %c2_i32_36 = arith.constant 2 : i32
    %122 = arith.muli %c2_i32_36, %121 : i32
    %123 = arith.index_cast %122 : i32 to index
    %124 = memref.load %arg1[%123] : memref<8xi32, #tpu.memory_space<smem>>
    %125 = arith.sitofp %124 : i32 to f32
    %c2_i32_37 = arith.constant 2 : i32
    %126 = arith.muli %c2_i32_37, %121 : i32
    %c1_i32_38 = arith.constant 1 : i32
    %127 = arith.addi %126, %c1_i32_38 : i32
    %128 = arith.index_cast %127 : i32 to index
    %129 = memref.load %arg1[%128] : memref<8xi32, #tpu.memory_space<smem>>
    %130 = arith.sitofp %129 : i32 to f32
    %131 = arith.index_cast %c2_i32_34 : i32 to index
    %c0_39 = arith.constant 0 : index
    %c0_40 = arith.constant 0 : index
    %132 = vector.load %arg2[%131, %c0_39, %c0_40] : memref<4x21x79xi32, #tpu.memory_space<vmem>>, vector<1x21x79xi32>
    %133 = vector.shape_cast %132 : vector<1x21x79xi32> to vector<21x79xi32>
    %134 = arith.sitofp %133 : vector<21x79xi32> to vector<21x79xf32>
    %135 = vector.broadcast %125 : f32 to vector<79x9xf32>
    %136 = arith.addf %4, %135 : vector<79x9xf32>
    %137 = math.floor %136 : vector<79x9xf32>
    %138 = arith.subf %136, %137 : vector<79x9xf32>
    %139 = arith.fptosi %137 : vector<79x9xf32> to vector<79x9xi32>
    %140 = arith.cmpi eq, %0, %139 : vector<79x9xi32>
    %cst_41 = arith.constant 1.000000e+00 : f32
    %141 = vector.broadcast %cst_41 : f32 to vector<79x9xf32>
    %142 = arith.subf %141, %138 : vector<79x9xf32>
    %cst_42 = arith.constant 0.000000e+00 : f32
    %143 = vector.broadcast %cst_42 : f32 to vector<79x9xf32>
    %144 = arith.select %140, %142, %143 : vector<79x9xi1>, vector<79x9xf32>
    %c1_i32_43 = arith.constant 1 : i32
    %145 = vector.broadcast %c1_i32_43 : i32 to vector<79x9xi32>
    %146 = arith.addi %139, %145 : vector<79x9xi32>
    %147 = arith.cmpi eq, %0, %146 : vector<79x9xi32>
    %cst_44 = arith.constant 0.000000e+00 : f32
    %148 = vector.broadcast %cst_44 : f32 to vector<79x9xf32>
    %149 = arith.select %147, %138, %148 : vector<79x9xi1>, vector<79x9xf32>
    %150 = arith.addf %144, %149 : vector<79x9xf32>
    %151 = vector.broadcast %130 : f32 to vector<9x21xf32>
    %152 = arith.addf %9, %151 : vector<9x21xf32>
    %153 = math.floor %152 : vector<9x21xf32>
    %154 = arith.subf %152, %153 : vector<9x21xf32>
    %155 = arith.fptosi %153 : vector<9x21xf32> to vector<9x21xi32>
    %156 = arith.cmpi eq, %5, %155 : vector<9x21xi32>
    %cst_45 = arith.constant 1.000000e+00 : f32
    %157 = vector.broadcast %cst_45 : f32 to vector<9x21xf32>
    %158 = arith.subf %157, %154 : vector<9x21xf32>
    %cst_46 = arith.constant 0.000000e+00 : f32
    %159 = vector.broadcast %cst_46 : f32 to vector<9x21xf32>
    %160 = arith.select %156, %158, %159 : vector<9x21xi1>, vector<9x21xf32>
    %c1_i32_47 = arith.constant 1 : i32
    %161 = vector.broadcast %c1_i32_47 : i32 to vector<9x21xi32>
    %162 = arith.addi %155, %161 : vector<9x21xi32>
    %163 = arith.cmpi eq, %5, %162 : vector<9x21xi32>
    %cst_48 = arith.constant 0.000000e+00 : f32
    %164 = vector.broadcast %cst_48 : f32 to vector<9x21xf32>
    %165 = arith.select %163, %154, %164 : vector<9x21xi1>, vector<9x21xf32>
    %166 = arith.addf %160, %165 : vector<9x21xf32>
    %cst_49 = arith.constant dense<0.000000e+00> : vector<9x79xf32>
    %167 = tpu.matmul %166, %134, %cst_49 {dimension_numbers = #tpu.dot_dimension_numbers<[1], [0], [0], [1], [0, 0, 1, 1], [], []>} : vector<9x21xf32>, vector<21x79xf32>, vector<9x79xf32> -> vector<9x79xf32>
    %cst_50 = arith.constant dense<0.000000e+00> : vector<9x9xf32>
    %168 = tpu.matmul %167, %150, %cst_50 {dimension_numbers = #tpu.dot_dimension_numbers<[1], [0], [0], [1], [0, 0, 1, 1], [], []>} : vector<9x79xf32>, vector<79x9xf32>, vector<9x9xf32> -> vector<9x9xf32>
    %169 = math.roundeven %168 : vector<9x9xf32>
    %170 = arith.fptosi %169 : vector<9x9xf32> to vector<9x9xi32>
    %171 = arith.index_cast %c2_i32_34 : i32 to index
    %c0_51 = arith.constant 0 : index
    %c0_52 = arith.constant 0 : index
    %172 = vector.load %arg3[%171, %c0_51, %c0_52] : memref<4x9x9xi32, #tpu.memory_space<vmem>>, vector<1x9x9xi32>
    %173 = vector.shape_cast %172 : vector<1x9x9xi32> to vector<9x9xi32>
    %174 = vector.shape_cast %170 : vector<9x9xi32> to vector<1x9x9xi32>
    tpu.vector_store %arg3[%171, %c0_51, %c0_52], %174 {strides = array<i32>} : memref<4x9x9xi32, #tpu.memory_space<vmem>>, vector<1x9x9xi32>,
    %c3_i32 = arith.constant 3 : i32
    %c4_i32_53 = arith.constant 4 : i32
    %175 = arith.muli %arg0, %c4_i32_53 : i32
    %176 = arith.addi %175, %c3_i32 : i32
    %c2_i32_54 = arith.constant 2 : i32
    %177 = arith.muli %c2_i32_54, %176 : i32
    %178 = arith.index_cast %177 : i32 to index
    %179 = memref.load %arg1[%178] : memref<8xi32, #tpu.memory_space<smem>>
    %180 = arith.sitofp %179 : i32 to f32
    %c2_i32_55 = arith.constant 2 : i32
    %181 = arith.muli %c2_i32_55, %176 : i32
    %c1_i32_56 = arith.constant 1 : i32
    %182 = arith.addi %181, %c1_i32_56 : i32
    %183 = arith.index_cast %182 : i32 to index
    %184 = memref.load %arg1[%183] : memref<8xi32, #tpu.memory_space<smem>>
    %185 = arith.sitofp %184 : i32 to f32
    %186 = arith.index_cast %c3_i32 : i32 to index
    %c0_57 = arith.constant 0 : index
    %c0_58 = arith.constant 0 : index
    %187 = vector.load %arg2[%186, %c0_57, %c0_58] : memref<4x21x79xi32, #tpu.memory_space<vmem>>, vector<1x21x79xi32>
    %188 = vector.shape_cast %187 : vector<1x21x79xi32> to vector<21x79xi32>
    %189 = arith.sitofp %188 : vector<21x79xi32> to vector<21x79xf32>
    %190 = vector.broadcast %180 : f32 to vector<79x9xf32>
    %191 = arith.addf %4, %190 : vector<79x9xf32>
    %192 = math.floor %191 : vector<79x9xf32>
    %193 = arith.subf %191, %192 : vector<79x9xf32>
    %194 = arith.fptosi %192 : vector<79x9xf32> to vector<79x9xi32>
    %195 = arith.cmpi eq, %0, %194 : vector<79x9xi32>
    %cst_59 = arith.constant 1.000000e+00 : f32
    %196 = vector.broadcast %cst_59 : f32 to vector<79x9xf32>
    %197 = arith.subf %196, %193 : vector<79x9xf32>
    %cst_60 = arith.constant 0.000000e+00 : f32
    %198 = vector.broadcast %cst_60 : f32 to vector<79x9xf32>
    %199 = arith.select %195, %197, %198 : vector<79x9xi1>, vector<79x9xf32>
    %c1_i32_61 = arith.constant 1 : i32
    %200 = vector.broadcast %c1_i32_61 : i32 to vector<79x9xi32>
    %201 = arith.addi %194, %200 : vector<79x9xi32>
    %202 = arith.cmpi eq, %0, %201 : vector<79x9xi32>
    %cst_62 = arith.constant 0.000000e+00 : f32
    %203 = vector.broadcast %cst_62 : f32 to vector<79x9xf32>
    %204 = arith.select %202, %193, %203 : vector<79x9xi1>, vector<79x9xf32>
    %205 = arith.addf %199, %204 : vector<79x9xf32>
    %206 = vector.broadcast %185 : f32 to vector<9x21xf32>
    %207 = arith.addf %9, %206 : vector<9x21xf32>
    %208 = math.floor %207 : vector<9x21xf32>
    %209 = arith.subf %207, %208 : vector<9x21xf32>
    %210 = arith.fptosi %208 : vector<9x21xf32> to vector<9x21xi32>
    %211 = arith.cmpi eq, %5, %210 : vector<9x21xi32>
    %cst_63 = arith.constant 1.000000e+00 : f32
    %212 = vector.broadcast %cst_63 : f32 to vector<9x21xf32>
    %213 = arith.subf %212, %209 : vector<9x21xf32>
    %cst_64 = arith.constant 0.000000e+00 : f32
    %214 = vector.broadcast %cst_64 : f32 to vector<9x21xf32>
    %215 = arith.select %211, %213, %214 : vector<9x21xi1>, vector<9x21xf32>
    %c1_i32_65 = arith.constant 1 : i32
    %216 = vector.broadcast %c1_i32_65 : i32 to vector<9x21xi32>
    %217 = arith.addi %210, %216 : vector<9x21xi32>
    %218 = arith.cmpi eq, %5, %217 : vector<9x21xi32>
    %cst_66 = arith.constant 0.000000e+00 : f32
    %219 = vector.broadcast %cst_66 : f32 to vector<9x21xf32>
    %220 = arith.select %218, %209, %219 : vector<9x21xi1>, vector<9x21xf32>
    %221 = arith.addf %215, %220 : vector<9x21xf32>
    %cst_67 = arith.constant dense<0.000000e+00> : vector<9x79xf32>
    %222 = tpu.matmul %221, %189, %cst_67 {dimension_numbers = #tpu.dot_dimension_numbers<[1], [0], [0], [1], [0, 0, 1, 1], [], []>} : vector<9x21xf32>, vector<21x79xf32>, vector<9x79xf32> -> vector<9x79xf32>
    %cst_68 = arith.constant dense<0.000000e+00> : vector<9x9xf32>
    %223 = tpu.matmul %222, %205, %cst_68 {dimension_numbers = #tpu.dot_dimension_numbers<[1], [0], [0], [1], [0, 0, 1, 1], [], []>} : vector<9x79xf32>, vector<79x9xf32>, vector<9x9xf32> -> vector<9x9xf32>
    %224 = math.roundeven %223 : vector<9x9xf32>
    %225 = arith.fptosi %224 : vector<9x9xf32> to vector<9x9xi32>
    %226 = arith.index_cast %c3_i32 : i32 to index
    %c0_69 = arith.constant 0 : index
    %c0_70 = arith.constant 0 : index
    %227 = vector.load %arg3[%226, %c0_69, %c0_70] : memref<4x9x9xi32, #tpu.memory_space<vmem>>, vector<1x9x9xi32>
    %228 = vector.shape_cast %227 : vector<1x9x9xi32> to vector<9x9xi32>
    %229 = vector.shape_cast %225 : vector<9x9xi32> to vector<1x9x9xi32>
    tpu.vector_store %arg3[%226, %c0_69, %c0_70], %229 {strides = array<i32>} : memref<4x9x9xi32, #tpu.memory_space<vmem>>, vector<1x9x9xi32>,
    %c4_i32_71 = arith.constant 4 : i32
    return
  }
  func.func @transform_0(%arg0: i32) -> i32 {
    %c0_i32 = arith.constant 0 : i32
    %c0_i32_0 = arith.constant 0 : i32
    return %c0_i32 : i32
  }
  func.func @transform_1(%arg0: i32) -> (i32, i32, i32) {
    %c0_i32 = arith.constant 0 : i32
    %c0_i32_0 = arith.constant 0 : i32
    %c0_i32_1 = arith.constant 0 : i32
    return %arg0, %c0_i32, %c0_i32_0 : i32, i32, i32
  }
  func.func @transform_2(%arg0: i32) -> (i32, i32, i32) {
    %c0_i32 = arith.constant 0 : i32
    %c0_i32_0 = arith.constant 0 : i32
    %c0_i32_1 = arith.constant 0 : i32
    return %arg0, %c0_i32, %c0_i32_0 : i32, i32, i32
  }
}

</mosaic_0001>

<bundles_post_ra>
// kernel: tpu_custom_call.1
= control target key start
LH: loop header
LB: loop body
LE: loop exit
PB: predicated region body
PF: predicated region fallthrough
CT: control target
= control target key end

     0   :  { %7 = vsyncpa [#allocation3], 0  ;;  %s826_s12 = smov [#allocation2]   ;;  %s1299_s0 = inlined_call_operand.vmem [shape: s32[8], index: 0, kind: input, shape index: {}]   ;;  %s1300_s1 = inlined_call_operand.vmem [shape: s32[4,21,79], index: 1, kind: input, shape index: {}]   ;;  %s1301_s2 = inlined_call_operand.vmem [shape: s32[4,9,9], index: 2, kind: output, shape index: {}]  }
   0x1   :  { %s13_s11 = sshll.u32 %s1299_s0, 4  ;;  %s14_s11 = int_to_ptr.vmem [resolvable:$true] %s13_s11 }
   0x2   :  { %16 = dma.vmem_to_smem %s14_s11, 16, %s826_s12, [#allocation3]  }
   0x3   :  { %824 = dma.done.wait [#allocation3], 16  }
   0x4   :  { %825 = vsyncadd [#allocation3], 4294967280 }
   0x5   :  { %23 = sfence }
   0x6   :  { %v51_v0 = vld [vmem:[%s1300_s1 + $0x10] sm:$0x1f]  ;;  %vm142_vm0 = vcmask 1044480   ;;  %v50_v1 = vld [vmem:[%s1300_s1 + $0x8] sm:$0xff]  ;;  %v49_v2 = vld [vmem:[%s1300_s1] sm:$0xff]  ;;  %v24_v3 = vlaneseq  ;;  %s704_s0 = sld [smem:[#allocation2 + $0x1]] }
   0x7   :  { %v54_v4 = vcvt.s32.f32 %v51_v0  ;;  %v53_v5 = vcvt.s32.f32 %v50_v1  ;;  %v728_v6 = vld [vmem:[%s1300_s1 + $0x40] sm:$0x1f]  ;;  %s725_s21 = sld [smem:[#allocation2 + $0x5]]  ;;  %v52_v8 = vcvt.s32.f32 %v49_v2  ;;  %v727_v9 = vld [vmem:[%s1300_s1 + $0x38] sm:$0xff]  ;;  %v726_v13 = vld [vmem:[%s1300_s1 + $0x30] sm:$0xff]  ;;  %vm135_vm3 = vcmask 171008  }
   0x8   :  { %v857_v7 = vshrl.u32 %v24_v3, 7  ;;  %v386_v11 = vcvt.s32.f32 %v728_v6  ;;  %v385_v15 = vcvt.s32.f32 %v727_v9  ;;  %v384_v18 = vcvt.s32.f32 %v726_v13  ;;  %s879_s28 = sld [smem:[#allocation2]]  ;;  %v715_v48 = vld [vmem:[%s1300_s1 + $0x28] sm:$0x1f]  ;;  %v714_v52 = vld [vmem:[%s1300_s1 + $0x20] sm:$0xff]  ;;  %v713_v54 = vld [vmem:[%s1300_s1 + $0x18] sm:$0xff] }
   0x9   :  { %705 = vmatpush.msk.msra.mxu0 %vm142_vm0, %v54_v4  ;;  %v881_v24 = vand.u32 127, %v24_v3  ;;  %s886_s29 = sld [smem:[#allocation2 + $0x4]]  ;;  %v223_v57 = vcvt.s32.f32 %v715_v48  ;;  %v222_v61 = vcvt.s32.f32 %v714_v52  ;;  %v221_v63 = vcvt.s32.f32 %v713_v54 }
   0xa   :  { %v39_v10 = vcvt.s32.f32 %v857_v7  ;;  %v865_v12 = vadd.s32 8, %v857_v7  ;;  %v914_v0 = vadd.s32 72, %v857_v7  ;;  %v917_v2 = vadd.s32 64, %v857_v7  ;;  %s712_s10 = sld [smem:[#allocation2 + $0x3]] }
   0xb   :  { %160 = vmatpush.msra.mxu0 %v53_v5  ;;  %v37_v47 = vcvt.s32.f32 %v881_v24  ;;  %716 = vmatpush.msk.msra.mxu2 %vm142_vm0, %v223_v57  ;;  %v920_v4 = vadd.s32 56, %v857_v7  ;;  %v923_v5 = vadd.s32 48, %v857_v7  ;;  %vm176_vm10 = vcmask 1046528   ;;  %s738_s16 = sld [smem:[#allocation2 + $0x7]] }
   0xc   :  { %v870_v14 = vadd.f32 -5.0, %v39_v10  ;;  %v40_v16 = vcvt.s32.f32 %v865_v12  ;;  %s48_s26 = scvt.s32.f32 %s704_s0  ;;  %v935_v13 = vadd.s32 32, %v857_v7  ;;  %s711_s17 = sld [smem:[#allocation2 + $0x2]] }
   0xd   :  { %161 = vmatpush.msra.mxu0 %v52_v8  ;;  %s379_s27 = scvt.s32.f32 %s725_s21  ;;  %v903_v53 = vadd.f32 -5.0, %v37_v47  ;;  %327 = vmatpush.msra.mxu2 %v222_v61 }
   0xe   :  { %v874_v17 = vadd.f32 -5.0, %v40_v16  ;;  %v112_v19 = vstv %s48_s26  ;;  %s45_s30 = scvt.s32.f32 %s879_s28 }
   0xf   :  { %729 = vmatpush.msk.msrb.mxu0 %vm142_vm0, %v386_v11  ;;  %v113_v20 = vadd.f32 %v112_v19, %v870_v14  ;;  %v444_v22 = vstv %s379_s27  ;;  %s376_s9 = scvt.s32.f32 %s886_s29  ;;  %v932_v11 = vadd.s32 40, %v857_v7  ;;  %328 = vmatpush.msra.mxu2 %v221_v63 }
  0x10   :  { %v114_v21 = vadd.f32 %v112_v19, %v874_v17  ;;  %v445_v23 = vadd.f32 %v444_v22, %v870_v14  ;;  %v446_v28 = vadd.f32 %v444_v22, %v874_v17  ;;  %v55_v51 = vstv %s45_s30  ;;  %s216_s11 = scvt.s32.f32 %s712_s10 }
  0x11   :  { %490 = vmatpush.msrb.mxu0 %v385_v15  ;;  %v115_v25 = vfloor.f32 %v113_v20  ;;  %v56_v60 = vadd.f32 %v55_v51, %v903_v53  ;;  %v387_v10 = vstv %s376_s9  ;;  %s542_s19 = scvt.s32.f32 %s738_s16 }
  0x12   :  { %v116_v26 = vfloor.f32 %v114_v21  ;;  %v447_v27 = vfloor.f32 %v445_v23  ;;  %v448_v38 = vfloor.f32 %v446_v28  ;;  %v388_v19 = vadd.f32 %v387_v10, %v903_v53  ;;  %s213_s20 = scvt.s32.f32 %s711_s17 }
  0x13   :  { %491 = vmatpush.msrb.mxu0 %v384_v18  ;;  %v117_v29 = vsub.f32 %v113_v20, %v115_v25  ;;  %v766_v30 = vcvt.f32.s32 %v115_v25  ;;  %v57_v1 = vfloor.f32 %v56_v60  ;;  %v952_v18 = vadd.s32 24, %v857_v7 }
  0x14   :  { %v768_v31 = vcvt.f32.s32 %v116_v26  ;;  %v118_v32 = vsub.f32 %v114_v21, %v116_v26  ;;  %v790_v33 = vcvt.f32.s32 %v447_v27  ;;  %v449_v37 = vsub.f32 %v445_v23, %v447_v27 }
  0x15   :  { %vm121_vm1 = vcmp.eq.s32.totalorder %v881_v24, %v766_v30  ;;  %v123_v34 = vsub.f32 1.0, %v117_v29  ;;  %v127_v35 = vadd.s32 1, %v766_v30  ;;  %v891_v45 = vsub.f32 %v446_v28, %v448_v38 }
  0x16   :  { %v128_v36 = vadd.s32 1, %v768_v31  ;;  %v124_v41 = vsub.f32 1.0, %v118_v32  ;;  %v459_v42 = vadd.s32 1, %v790_v33  ;;  %vm122_vm4 = vcmp.eq.s32.totalorder %v881_v24, %v768_v31 }
  0x17   :  { %v125_v39 = vsel %vm121_vm1, %v123_v34, 0.0  ;;  %vm129_vm2 = vcmp.eq.s32.totalorder %v881_v24, %v127_v35  ;;  %v455_v44 = vsub.f32 1.0, %v449_v37  ;;  %vm453_vm6 = vcmp.eq.s32.totalorder %v881_v24, %v790_v33 }
  0x18   :  { %v131_v40 = vsel %vm129_vm2, %v117_v29, 0.0  ;;  %vm130_vm5 = vcmp.eq.s32.totalorder %v881_v24, %v128_v36  ;;  %v792_v46 = vcvt.f32.s32 %v448_v38  ;;  %v126_v49 = vsel %vm122_vm4, %v124_v41, 0.0 }
  0x19   :  { %v133_v43 = vadd.f32 %v131_v40, %v125_v39  ;;  %v132_v50 = vsel %vm130_vm5, %v118_v32, 0.0  ;;  %vm461_vm7 = vcmp.eq.s32.totalorder %v881_v24, %v459_v42  ;;  %v457_v55 = vsel %vm453_vm6, %v455_v44, 0.0 }
  0x1a   :  { %v456_v56 = vsub.f32 1.0, %v891_v45  ;;  %v134_v58 = vadd.f32 %v132_v50, %v126_v49  ;;  %v463_v59 = vsel %vm461_vm7, %v449_v37, 0.0  ;;  %vm454_vm8 = vcmp.eq.s32.totalorder %v881_v24, %v792_v46 }
  0x1b   :  { %706 = vmatmul.msk.f32.vlgmr.msra.gmra.mxu0 %vm135_vm3, %v133_v43  ;;  %v460_v62 = vadd.s32 1, %v792_v46  ;;  %v465_v3 = vadd.f32 %v463_v59, %v457_v55  ;;  %v926_v8 = vsub.f32 %v56_v60, %v57_v1  ;;  %v928_v9 = vcvt.f32.s32 %v57_v1 }
  0x1c   :  { %v458_v6 = vsel %vm454_vm8, %v456_v56, 0.0  ;;  %v975_v30 = vadd.s32 16, %v857_v7  ;;  %v389_v36 = vfloor.f32 %v388_v19  ;;  %v281_v60 = vstv %s216_s11 }
  0x1d   :  { %vm462_vm9 = vcmp.eq.s32.totalorder %v881_v24, %v460_v62  ;;  %vm69_vm11 = vcmp.eq.s32.totalorder %v914_v0, %v928_v9  ;;  %v940_v15 = vsub.f32 1.0, %v926_v8  ;;  %v943_v16 = vadd.s32 1, %v928_v9 }
  0x1e   :  { %vm68_vm12 = vcmp.eq.s32.totalorder %v917_v2, %v928_v9  ;;  %vm67_vm13 = vcmp.eq.s32.totalorder %v920_v4, %v928_v9  ;;  %vm66_vm14 = vcmp.eq.s32.totalorder %v923_v5, %v928_v9  ;;  %vm65_vm4 = vcmp.eq.s32.totalorder %v932_v11, %v928_v9 }
  0x1f   :  { %v80_v20 = vsel %vm69_vm11, %v940_v15, 0.0  ;;  %vm91_vm15 = vcmp.eq.s32.totalorder %v914_v0, %v943_v16  ;;  %v79_v21 = vsel %vm68_vm12, %v940_v15, 0.0  ;;  %vm90_vm1 = vcmp.eq.s32.totalorder %v917_v2, %v943_v16 }
  0x20   :  { %v101_v22 = vsel %vm91_vm15, %v926_v8, 0.0  ;;  %v100_v23 = vsel %vm90_vm1, %v926_v8, 0.0  ;;  %v78_v25 = vsel %vm67_vm13, %v940_v15, 0.0  ;;  %vm89_vm2 = vcmp.eq.s32.totalorder %v920_v4, %v943_v16 }
  0x21   :  { %v111_v26 = vadd.f32 %v101_v22, %v80_v20  ;;  %v110_v27 = vadd.f32 %v100_v23, %v79_v21  ;;  %v99_v28 = vsel %vm89_vm2, %v926_v8, 0.0  ;;  %v77_v29 = vsel %vm66_vm14, %v940_v15, 0.0 }
  0x22   :  { %vm88_vm5 = vcmp.eq.s32.totalorder %v923_v5, %v943_v16  ;;  %vm87_vm6 = vcmp.eq.s32.totalorder %v932_v11, %v943_v16  ;;  %v109_v31 = vadd.f32 %v99_v28, %v78_v25  ;;  %vm64_vm7 = vcmp.eq.s32.totalorder %v935_v13, %v928_v9 }
  0x23   :  { %707 = vmatmul.msk.f32.gmra.mxu0 %vm135_vm3, %v134_v58  ;;  %708 = vmatpush.msk.msra.mxu1 %vm176_vm10, %v111_v26  ;;  %v98_v32 = vsel %vm88_vm5, %v926_v8, 0.0  ;;  %vm86_vm8 = vcmp.eq.s32.totalorder %v935_v13, %v943_v16  ;;  %v464_v33 = vsel %vm462_vm9, %v891_v45, 0.0  ;;  %v76_v34 = vsel %vm65_vm4, %v940_v15, 0.0 }
  0x24   :  { %v97_v35 = vsel %vm87_vm6, %v926_v8, 0.0  ;;  %v108_v37 = vadd.f32 %v98_v32, %v77_v29  ;;  %vm63_vm11 = vcmp.eq.s32.totalorder %v952_v18, %v928_v9  ;;  %vm85_vm12 = vcmp.eq.s32.totalorder %v952_v18, %v943_v16 }
  0x25   :  { %187 = vmatpush.msra.mxu1 %v110_v27  ;;  %v75_v38 = vsel %vm64_vm7, %v940_v15, 0.0  ;;  %v96_v39 = vsel %vm86_vm8, %v926_v8, 0.0  ;;  %vm62_vm9 = vcmp.eq.s32.totalorder %v975_v30, %v928_v9  ;;  %v466_v40 = vadd.f32 %v464_v33, %v458_v6 }
  0x26   :  { %v107_v41 = vadd.f32 %v97_v35, %v76_v34  ;;  %vm84_vm13 = vcmp.eq.s32.totalorder %v975_v30, %v943_v16  ;;  %v74_v42 = vsel %vm63_vm11, %v940_v15, 0.0  ;;  %v95_v43 = vsel %vm85_vm12, %v926_v8, 0.0 }
  0x27   :  { %188 = vmatpush.msra.mxu1 %v109_v31  ;;  %v1001_v44 = vsub.f32 %v388_v19, %v389_v36  ;;  %v1003_v45 = vcvt.f32.s32 %v389_v36  ;;  %v106_v46 = vadd.f32 %v96_v39, %v75_v38  ;;  %v73_v47 = vsel %vm62_vm9, %v940_v15, 0.0 }
  0x28   :  { %vm61_vm14 = vcmp.eq.s32.totalorder %v865_v12, %v928_v9  ;;  %vm83_vm15 = vcmp.eq.s32.totalorder %v865_v12, %v943_v16  ;;  %v94_v48 = vsel %vm84_vm13, %v926_v8, 0.0  ;;  %v105_v51 = vadd.f32 %v95_v43, %v74_v42 }
  0x29   :  { %189 = vmatpush.msra.mxu1 %v108_v37  ;;  %vm401_vm1 = vcmp.eq.s32.totalorder %v914_v0, %v1003_v45  ;;  %v1014_v49 = vsub.f32 1.0, %v1001_v44  ;;  %v1017_v50 = vadd.s32 1, %v1003_v45  ;;  %v72_v52 = vsel %vm61_vm14, %v940_v15, 0.0 }
  0x2a   :  { %v93_v54 = vsel %vm83_vm15, %v926_v8, 0.0  ;;  %v104_v56 = vadd.f32 %v94_v48, %v73_v47  ;;  %v282_v61 = vadd.f32 %v281_v60, %v870_v14  ;;  %vm60_vm4 = vcmp.eq.s32.totalorder %v857_v7, %v928_v9 }
  0x2b   :  { %730 = vmatmul.msk.f32.vlgmr.msrb.gmra.mxu0 %vm135_vm3, %v465_v3  ;;  %190 = vmatpush.msra.mxu1 %v107_v41  ;;  %v412_v55 = vsel %vm401_vm1, %v1014_v49, 0.0  ;;  %vm423_vm2 = vcmp.eq.s32.totalorder %v914_v0, %v1017_v50  ;;  %v103_v59 = vadd.f32 %v93_v54, %v72_v52  ;;  %vm82_vm5 = vcmp.eq.s32.totalorder %v857_v7, %v943_v16 }
  0x2c   :  { %v433_v57 = vsel %vm423_vm2, %v1001_v44, 0.0  ;;  %v284_v62 = vfloor.f32 %v282_v61  ;;  %vm400_vm6 = vcmp.eq.s32.totalorder %v917_v2, %v1003_v45  ;;  %vm422_vm7 = vcmp.eq.s32.totalorder %v917_v2, %v1017_v50 }
  0x2d   :  { %191 = vmatpush.msra.mxu1 %v106_v46  ;;  %v443_v58 = vadd.f32 %v433_v57, %v412_v55  ;;  %v71_v6 = vsel %vm60_vm4, %v940_v15, 0.0  ;;  %v92_v10 = vsel %vm82_vm5, %v926_v8, 0.0  ;;  %v411_v19 = vsel %vm400_vm6, %v1014_v49, 0.0 }
  0x2e   :  { %v778_v63 = vcvt.f32.s32 %v284_v62  ;;  %v286_v1 = vsub.f32 %v282_v61, %v284_v62  ;;  %v432_v20 = vsel %vm422_vm7, %v1001_v44, 0.0  ;;  %v102_v21 = vadd.f32 %v92_v10, %v71_v6 }
  0x2f   :  { %192 = vmatpush.msra.mxu1 %v105_v51  ;;  %732 = vmatpush.msk.msrb.mxu2 %vm176_vm10, %v443_v58  ;;  %v442_v22 = vadd.f32 %v432_v20, %v411_v19  ;;  %vm399_vm12 = vcmp.eq.s32.totalorder %v920_v4, %v1003_v45  ;;  %vm421_vm9 = vcmp.eq.s32.totalorder %v920_v4, %v1017_v50  ;;  %v607_v6 = vstv %s542_s19 }
  0x30   :  { %v296_v3 = vadd.s32 1, %v778_v63  ;;  %vm290_vm8 = vcmp.eq.s32.totalorder %v881_v24, %v778_v63  ;;  %v292_v9 = vsub.f32 1.0, %v286_v1  ;;  %v283_v15 = vadd.f32 %v281_v60, %v874_v17  ;;  %v741_v63 = vld [vmem:[%s1300_s1 + $0x58] sm:$0x1f] }
  0x31   :  { %193 = vmatpush.msra.mxu1 %v104_v56  ;;  %515 = vmatpush.msrb.mxu2 %v442_v22  ;;  %v410_v23 = vsel %vm399_vm12, %v1014_v49, 0.0  ;;  %v431_v26 = vsel %vm421_vm9, %v1001_v44, 0.0  ;;  %vm398_vm13 = vcmp.eq.s32.totalorder %v923_v5, %v1003_v45  ;;  %vm420_vm14 = vcmp.eq.s32.totalorder %v923_v5, %v1017_v50 }
  0x32   :  { %vm298_vm11 = vcmp.eq.s32.totalorder %v881_v24, %v296_v3  ;;  %v294_v8 = vsel %vm290_vm8, %v292_v9, 0.0  ;;  %v441_v27 = vadd.f32 %v431_v26, %v410_v23  ;;  %v409_v28 = vsel %vm398_vm13, %v1014_v49, 0.0 }
  0x33   :  { %731 = vmatmul.msk.f32.gmra.mxu0 %vm135_vm3, %v466_v40  ;;  %194 = vmatpush.msra.mxu1 %v103_v59  ;;  %v300_v16 = vsel %vm298_vm11, %v286_v1, 0.0  ;;  %v430_v29 = vsel %vm420_vm14, %v1001_v44, 0.0  ;;  %vm397_vm15 = vcmp.eq.s32.totalorder %v932_v11, %v1003_v45  ;;  %vm419_vm1 = vcmp.eq.s32.totalorder %v932_v11, %v1017_v50 }
  0x34   :  { %v302_v25 = vadd.f32 %v300_v16, %v294_v8  ;;  %v440_v31 = vadd.f32 %v430_v29, %v409_v28  ;;  %v408_v32 = vsel %vm397_vm15, %v1014_v49, 0.0  ;;  %v285_v33 = vfloor.f32 %v283_v15  ;;  %516 = vmatpush.msrb.mxu2 %v441_v27 }
  0x35   :  { %195 = vmatpush.msra.mxu1 %v102_v21  ;;  %v429_v34 = vsel %vm419_vm1, %v1001_v44, 0.0  ;;  %vm396_vm2 = vcmp.eq.s32.totalorder %v935_v13, %v1003_v45  ;;  %vm418_vm4 = vcmp.eq.s32.totalorder %v935_v13, %v1017_v50  ;;  %vm395_vm5 = vcmp.eq.s32.totalorder %v952_v18, %v1003_v45 }
  0x36   :  { %717 = vmatmul.msk.f32.vlgmr.msra.gmra.mxu2 %vm135_vm3, %v302_v25  ;;  %v439_v35 = vadd.f32 %v429_v34, %v408_v32  ;;  %v407_v36 = vsel %vm396_vm2, %v1014_v49, 0.0  ;;  %v428_v37 = vsel %vm418_vm4, %v1001_v44, 0.0  ;;  %v287_v38 = vsub.f32 %v283_v15, %v285_v33 }
  0x37   :  { %517 = vmatpush.msrb.mxu2 %v440_v31  ;;  %v438_v39 = vadd.f32 %v428_v37, %v407_v36  ;;  %v780_v40 = vcvt.f32.s32 %v285_v33  ;;  %vm417_vm6 = vcmp.eq.s32.totalorder %v952_v18, %v1017_v50  ;;  %v406_v42 = vsel %vm395_vm5, %v1014_v49, 0.0 }
  0x38   :  { %v293_v41 = vsub.f32 1.0, %v287_v38  ;;  %v427_v43 = vsel %vm417_vm6, %v1001_v44, 0.0  ;;  %vm394_vm8 = vcmp.eq.s32.totalorder %v975_v30, %v1003_v45  ;;  %vm416_vm11 = vcmp.eq.s32.totalorder %v975_v30, %v1017_v50 }
  0x39   :  { %518 = vmatpush.msrb.mxu2 %v439_v35  ;;  %vm291_vm7 = vcmp.eq.s32.totalorder %v881_v24, %v780_v40  ;;  %v297_v46 = vadd.s32 1, %v780_v40  ;;  %v437_v47 = vadd.f32 %v427_v43, %v406_v42  ;;  %v405_v51 = vsel %vm394_vm8, %v1014_v49, 0.0 }
  0x3a   :  { %v295_v48 = vsel %vm291_vm7, %v293_v41, 0.0  ;;  %vm393_vm12 = vcmp.eq.s32.totalorder %v865_v12, %v1003_v45  ;;  %v426_v52 = vsel %vm416_vm11, %v1001_v44, 0.0  ;;  %vm415_vm13 = vcmp.eq.s32.totalorder %v865_v12, %v1017_v50 }
  0x3b   :  { %519 = vmatpush.msrb.mxu2 %v438_v39  ;;  %vm299_vm9 = vcmp.eq.s32.totalorder %v881_v24, %v297_v46  ;;  %v404_v54 = vsel %vm393_vm12, %v1014_v49, 0.0  ;;  %v436_v56 = vadd.f32 %v426_v52, %v405_v51  ;;  %v425_v57 = vsel %vm415_vm13, %v1001_v44, 0.0 }
  0x3c   :  { %v301_v55 = vsel %vm299_vm9, %v287_v38, 0.0  ;;  %vm392_vm14 = vcmp.eq.s32.totalorder %v857_v7, %v1003_v45  ;;  %vm414_vm15 = vcmp.eq.s32.totalorder %v857_v7, %v1017_v50  ;;  %v435_v59 = vadd.f32 %v425_v57, %v404_v54  ;;  %v740_v45 = vld [vmem:[%s1300_s1 + $0x50] sm:$0xff] }
  0x3d   :  { %v303_v58 = vadd.f32 %v301_v55, %v295_v48  ;;  %520 = vmatpush.msrb.mxu2 %v437_v47  ;;  %v403_v60 = vsel %vm392_vm14, %v1014_v49, 0.0  ;;  %v424_v61 = vsel %vm414_vm15, %v1001_v44, 0.0  ;;  %v549_v1 = vcvt.s32.f32 %v741_v63  ;;  %v739_v44 = vld [vmem:[%s1300_s1 + $0x48] sm:$0xff]  ;;  %s737_s1 = sld [smem:[#allocation2 + $0x6]] }
  0x3e   :  { %v434_v62 = vadd.f32 %v424_v61, %v403_v60  ;;  %v548_v50 = vcvt.s32.f32 %v740_v45  ;;  %v547_v49 = vcvt.s32.f32 %v739_v44  ;;  %vm169_vm1 = vcmask 646144  }
  0x3f   :  { %718 = vmatmul.msk.f32.gmra.mxu2 %vm135_vm3, %v303_v58  ;;  %742 = vmatpush.msk.msrb.mxu1 %vm142_vm0, %v549_v1  ;;  %v608_v10 = vadd.f32 %v607_v6, %v870_v14  ;;  %v224_v19 = vstv %s213_s20  ;;  %v609_v21 = vadd.f32 %v607_v6, %v874_v17 }
  0x40   :  { %521 = vmatpush.msrb.mxu2 %v436_v56  ;;  %v225_v20 = vadd.f32 %v224_v19, %v903_v53 }
  0x41   :  { %653 = vmatpush.msrb.mxu1 %v548_v50  ;;  %v610_v22 = vfloor.f32 %v608_v10  ;;  %v611_v25 = vfloor.f32 %v609_v21 }
  0x42   :  { %522 = vmatpush.msrb.mxu2 %v435_v59  ;;  %v226_v9 = vfloor.f32 %v225_v20 }
  0x43   :  { %654 = vmatpush.msrb.mxu1 %v547_v49  ;;  %v612_v15 = vsub.f32 %v608_v10, %v610_v22  ;;  %v802_v8 = vcvt.f32.s32 %v610_v22  ;;  %v804_v42 = vcvt.f32.s32 %v611_v25  ;;  %v613_v56 = vsub.f32 %v609_v21, %v611_v25  ;;  %s539_s21 = scvt.s32.f32 %s737_s1 }
  0x44   :  { %523 = vmatpush.msrb.mxu2 %v434_v62  ;;  %v1110_v16 = vsub.f32 %v225_v20, %v226_v9  ;;  %v1112_v23 = vcvt.f32.s32 %v226_v9 }
  0x45   :  { %v618_v26 = vsub.f32 1.0, %v612_v15  ;;  %v622_v27 = vadd.s32 1, %v802_v8  ;;  %v623_v58 = vadd.s32 1, %v804_v42  ;;  %v619_v60 = vsub.f32 1.0, %v613_v56 }
  0x46   :  { %750 = vmatpush.msk.msra.mxu2 %vm142_vm0, %v549_v1  ;;  %vm616_vm0 = vcmp.eq.s32.totalorder %v881_v24, %v802_v8  ;;  %vm238_vm2 = vcmp.eq.s32.totalorder %v914_v0, %v1112_v23  ;;  %v1118_v14 = vsub.f32 1.0, %v1110_v16  ;;  %v1121_v17 = vadd.s32 1, %v1112_v23 }
  0x47   :  { %vm237_vm4 = vcmp.eq.s32.totalorder %v917_v2, %v1112_v23  ;;  %v620_v29 = vsel %vm616_vm0, %v618_v26, 0.0  ;;  %vm624_vm5 = vcmp.eq.s32.totalorder %v881_v24, %v622_v27  ;;  %vm236_vm6 = vcmp.eq.s32.totalorder %v920_v4, %v1112_v23 }
  0x48   :  { %751 = vmatpush.msra.mxu2 %v548_v50  ;;  %vm235_vm7 = vcmp.eq.s32.totalorder %v923_v5, %v1112_v23  ;;  %v626_v31 = vsel %vm624_vm5, %v612_v15, 0.0  ;;  %v249_v32 = vsel %vm238_vm2, %v1118_v14, 0.0  ;;  %vm260_vm8 = vcmp.eq.s32.totalorder %v914_v0, %v1121_v17 }
  0x49   :  { %v248_v33 = vsel %vm237_vm4, %v1118_v14, 0.0  ;;  %v628_v34 = vadd.f32 %v626_v31, %v620_v29  ;;  %v270_v35 = vsel %vm260_vm8, %v1110_v16, 0.0  ;;  %vm259_vm11 = vcmp.eq.s32.totalorder %v917_v2, %v1121_v17 }
  0x4a   :  { %752 = vmatpush.msra.mxu2 %v547_v49  ;;  %v247_v36 = vsel %vm236_vm6, %v1118_v14, 0.0  ;;  %v280_v37 = vadd.f32 %v270_v35, %v249_v32  ;;  %v269_v38 = vsel %vm259_vm11, %v1110_v16, 0.0  ;;  %vm258_vm12 = vcmp.eq.s32.totalorder %v920_v4, %v1121_v17 }
  0x4b   :  { %v246_v39 = vsel %vm235_vm7, %v1118_v14, 0.0  ;;  %v279_v40 = vadd.f32 %v269_v38, %v248_v33  ;;  %v268_v41 = vsel %vm258_vm12, %v1110_v16, 0.0  ;;  %vm257_vm9 = vcmp.eq.s32.totalorder %v923_v5, %v1121_v17 }
  0x4c   :  { %vm234_vm13 = vcmp.eq.s32.totalorder %v932_v11, %v1112_v23  ;;  %719 = vmatpush.msk.msra.mxu3 %vm176_vm10, %v280_v37  ;;  %v278_v43 = vadd.f32 %v268_v41, %v247_v36  ;;  %v267_v46 = vsel %vm257_vm9, %v1110_v16, 0.0  ;;  %vm256_vm14 = vcmp.eq.s32.totalorder %v932_v11, %v1121_v17 }
  0x4d   :  { %v245_v47 = vsel %vm234_vm13, %v1118_v14, 0.0  ;;  %v266_v48 = vsel %vm256_vm14, %v1110_v16, 0.0  ;;  %vm233_vm15 = vcmp.eq.s32.totalorder %v935_v13, %v1112_v23  ;;  %vm255_vm0 = vcmp.eq.s32.totalorder %v935_v13, %v1121_v17 }
  0x4e   :  { %352 = vmatpush.msra.mxu3 %v279_v40  ;;  %v277_v52 = vadd.f32 %v267_v46, %v246_v39  ;;  %v244_v54 = vsel %vm233_vm15, %v1118_v14, 0.0  ;;  %v265_v55 = vsel %vm255_vm0, %v1110_v16, 0.0  ;;  %v276_v57 = vadd.f32 %v266_v48, %v245_v47 }
  0x4f   :  { %v275_v59 = vadd.f32 %v265_v55, %v244_v54  ;;  %vm617_vm2 = vcmp.eq.s32.totalorder %v881_v24, %v804_v42  ;;  %vm625_vm4 = vcmp.eq.s32.totalorder %v881_v24, %v623_v58  ;;  %vm232_vm5 = vcmp.eq.s32.totalorder %v952_v18, %v1112_v23 }
  0x50   :  { %353 = vmatpush.msra.mxu3 %v278_v43  ;;  %v621_v62 = vsel %vm617_vm2, %v619_v60, 0.0  ;;  %v627_v63 = vsel %vm625_vm4, %v613_v56, 0.0  ;;  %vm254_vm6 = vcmp.eq.s32.totalorder %v952_v18, %v1121_v17  ;;  %v243_v1 = vsel %vm232_vm5, %v1118_v14, 0.0 }
  0x51   :  { %v629_v45 = vadd.f32 %v627_v63, %v621_v62  ;;  %v264_v24 = vsel %vm254_vm6, %v1110_v16, 0.0  ;;  %vm231_vm7 = vcmp.eq.s32.totalorder %v975_v30, %v1112_v23  ;;  %vm253_vm8 = vcmp.eq.s32.totalorder %v975_v30, %v1121_v17 }
  0x52   :  { %354 = vmatpush.msra.mxu3 %v277_v52  ;;  %v274_v50 = vadd.f32 %v264_v24, %v243_v1  ;;  %v242_v44 = vsel %vm231_vm7, %v1118_v14, 0.0  ;;  %v263_v49 = vsel %vm253_vm8, %v1110_v16, 0.0  ;;  %vm252_vm11 = vcmp.eq.s32.totalorder %v865_v12, %v1121_v17 }
  0x53   :  { %v262_v10 = vsel %vm252_vm11, %v1110_v16, 0.0  ;;  %vm229_vm12 = vcmp.eq.s32.totalorder %v857_v7, %v1112_v23  ;;  %vm251_vm9 = vcmp.eq.s32.totalorder %v857_v7, %v1121_v17  ;;  %v550_v9 = vstv %s539_s21 }
  0x54   :  { %355 = vmatpush.msra.mxu3 %v276_v57  ;;  %v240_v20 = vsel %vm229_vm12, %v1118_v14, 0.0  ;;  %v261_v21 = vsel %vm251_vm9, %v1110_v16, 0.0  ;;  %v551_v8 = vadd.f32 %v550_v9, %v903_v53 }
  0x55   :  { %v271_v22 = vadd.f32 %v261_v21, %v240_v20 }
  0x56   :  { %356 = vmatpush.msra.mxu3 %v275_v59  ;;  %v552_v25 = vfloor.f32 %v551_v8 }
  0x58   :  { %357 = vmatpush.msra.mxu3 %v274_v50  ;;  %v1192_v26 = vsub.f32 %v551_v8, %v552_v25 }
  0x5a   :  { %v1199_v16 = vsub.f32 1.0, %v1192_v26 }
  0x98   :  { %v163_v3 = vpop.f32.mrf.mxu0 }
  0x99   :  { %709 = vmatmul.msk.f32.vlgmr.msra.gmra.mxu1 %vm169_vm1, %v163_v3  ;;  %v273_v3 = vadd.f32 %v263_v49, %v242_v44 }
  0x9b   :  { %358 = vmatpush.msra.mxu3 %v273_v3 }
  0xa0   :  { %v166_v28 = vpop.f32.mrf.mxu0 }
  0xa1   :  { %710 = vmatmul.msk.f32.gmra.mxu1 %vm169_vm1, %v166_v28 }
  0xa8   :  { %v493_v51 = vpop.f32.mrf.mxu0 }
  0xa9   :  { %733 = vmatmul.msk.f32.vlgmr.msrb.gmra.mxu2 %vm169_vm1, %v493_v51  ;;  %743 = vmatmul.msk.f32.vlgmr.msrb.gmra.mxu1 %vm135_vm3, %v628_v34 }
  0xb0   :  { %v496_v61 = vpop.f32.mrf.mxu0 }
  0xb1   :  { %734 = vmatmul.msk.f32.gmra.mxu2 %vm169_vm1, %v496_v61 }
  0xb9   :  { %744 = vmatmul.msk.f32.vlgmr.msra.gmra.mxu2 %vm135_vm3, %v629_v45  ;;  %vm230_vm3 = vcmp.eq.s32.totalorder %v865_v12, %v1112_v23  ;;  %v330_v15 = vpop.f32.mrf.mxu2  ;;  %v1194_v23 = vcvt.f32.s32 %v552_v25 }
  0xba   :  { %v241_v6 = vsel %vm230_vm3, %v1118_v14, 0.0 }
  0xbb   :  { %v272_v19 = vadd.f32 %v262_v10, %v241_v6  ;;  %vm564_vm13 = vcmp.eq.s32.totalorder %v914_v0, %v1194_v23  ;;  %v1202_v27 = vadd.s32 1, %v1194_v23  ;;  %vm563_vm15 = vcmp.eq.s32.totalorder %v917_v2, %v1194_v23 }
  0xbc   :  { %v575_v28 = vsel %vm564_vm13, %v1199_v16, 0.0  ;;  %v574_v29 = vsel %vm563_vm15, %v1199_v16, 0.0  ;;  %vm562_vm2 = vcmp.eq.s32.totalorder %v920_v4, %v1194_v23  ;;  %vm561_vm5 = vcmp.eq.s32.totalorder %v923_v5, %v1194_v23 }
  0xbd   :  { %359 = vmatpush.msra.mxu3 %v272_v19  ;;  %vm586_vm14 = vcmp.eq.s32.totalorder %v914_v0, %v1202_v27  ;;  %vm585_vm0 = vcmp.eq.s32.totalorder %v917_v2, %v1202_v27  ;;  %vm584_vm4 = vcmp.eq.s32.totalorder %v920_v4, %v1202_v27  ;;  %v573_v0 = vsel %vm562_vm2, %v1199_v16, 0.0 }
  0xbe   :  { %v596_v53 = vsel %vm586_vm14, %v1192_v26, 0.0  ;;  %v595_v31 = vsel %vm585_vm0, %v1192_v26, 0.0  ;;  %v594_v2 = vsel %vm584_vm4, %v1192_v26, 0.0  ;;  %vm583_vm6 = vcmp.eq.s32.totalorder %v923_v5, %v1202_v27 }
  0xbf   :  { %360 = vmatpush.msra.mxu3 %v271_v22  ;;  %v606_v14 = vadd.f32 %v596_v53, %v575_v28  ;;  %v605_v32 = vadd.f32 %v595_v31, %v574_v29  ;;  %v604_v33 = vadd.f32 %v594_v2, %v573_v0  ;;  %v572_v34 = vsel %vm561_vm5, %v1199_v16, 0.0 }
  0xc0   :  { %720 = vmatmul.msk.f32.vlgmr.msra.gmra.mxu3 %vm169_vm1, %v330_v15  ;;  %v593_v4 = vsel %vm583_vm6, %v1192_v26, 0.0  ;;  %vm582_vm7 = vcmp.eq.s32.totalorder %v932_v11, %v1202_v27  ;;  %vm559_vm8 = vcmp.eq.s32.totalorder %v935_v13, %v1194_v23  ;;  %vm581_vm3 = vcmp.eq.s32.totalorder %v935_v13, %v1202_v27 }
  0xc1   :  { %745 = vmatpush.msk.msra.mxu0 %vm176_vm10, %v606_v14  ;;  %753 = vmatpush.msk.msrb.mxu3 %vm176_vm10, %v606_v14  ;;  %v603_v35 = vadd.f32 %v593_v4, %v572_v34  ;;  %vm560_vm10 = vcmp.eq.s32.totalorder %v932_v11, %v1194_v23  ;;  %v592_v37 = vsel %vm582_vm7, %v1192_v26, 0.0  ;;  %v570_v38 = vsel %vm559_vm8, %v1199_v16, 0.0 }
  0xc2   :  { %v333_v17 = vpop.f32.mrf.mxu2  ;;  %v571_v36 = vsel %vm560_vm10, %v1199_v16, 0.0  ;;  %v591_v39 = vsel %vm581_vm3, %v1192_v26, 0.0  ;;  %vm558_vm11 = vcmp.eq.s32.totalorder %v952_v18, %v1194_v23  ;;  %vm580_vm12 = vcmp.eq.s32.totalorder %v952_v18, %v1202_v27 }
  0xc3   :  { %678 = vmatpush.msra.mxu0 %v605_v32  ;;  %754 = vmatpush.msrb.mxu3 %v605_v32  ;;  %v602_v5 = vadd.f32 %v592_v37, %v571_v36  ;;  %v601_v11 = vadd.f32 %v591_v39, %v570_v38  ;;  %v569_v40 = vsel %vm558_vm11, %v1199_v16, 0.0  ;;  %v590_v41 = vsel %vm580_vm12, %v1192_v26, 0.0 }
  0xc4   :  { %v600_v13 = vadd.f32 %v590_v41, %v569_v40  ;;  %vm557_vm9 = vcmp.eq.s32.totalorder %v975_v30, %v1194_v23  ;;  %vm579_vm13 = vcmp.eq.s32.totalorder %v975_v30, %v1202_v27  ;;  %vm205_vm14 = vcmask 72704  }
  0xc5   :  { %679 = vmatpush.msra.mxu0 %v604_v33  ;;  %755 = vmatpush.msrb.mxu3 %v604_v33  ;;  %v568_v42 = vsel %vm557_vm9, %v1199_v16, 0.0  ;;  %v589_v43 = vsel %vm579_vm13, %v1192_v26, 0.0  ;;  %vm556_vm15 = vcmp.eq.s32.totalorder %v865_v12, %v1194_v23  ;;  %vm578_vm0 = vcmp.eq.s32.totalorder %v865_v12, %v1202_v27 }
  0xc6   :  { %v599_v46 = vadd.f32 %v589_v43, %v568_v42  ;;  %v567_v30 = vsel %vm556_vm15, %v1199_v16, 0.0  ;;  %v588_v48 = vsel %vm578_vm0, %v1192_v26, 0.0  ;;  %vm555_vm2 = vcmp.eq.s32.totalorder %v857_v7, %v1194_v23 }
  0xc7   :  { %680 = vmatpush.msra.mxu0 %v603_v35  ;;  %756 = vmatpush.msrb.mxu3 %v603_v35  ;;  %v598_v51 = vadd.f32 %v588_v48, %v567_v30  ;;  %vm577_vm4 = vcmp.eq.s32.totalorder %v857_v7, %v1202_v27  ;;  %v566_v12 = vsel %vm555_vm2, %v1199_v16, 0.0  ;;  %vm207_vm5 = vcmask 65536  }
  0xc8   :  { %721 = vmatmul.msk.f32.gmra.mxu3 %vm169_vm1, %v333_v17  ;;  %v587_v52 = vsel %vm577_vm4, %v1192_v26, 0.0 }
  0xc9   :  { %681 = vmatpush.msra.mxu0 %v602_v5  ;;  %757 = vmatpush.msrb.mxu3 %v602_v5  ;;  %v597_v54 = vadd.f32 %v587_v52, %v566_v12 }
  0xcb   :  { %682 = vmatpush.msra.mxu0 %v601_v11  ;;  %758 = vmatpush.msrb.mxu3 %v601_v11 }
  0xcd   :  { %683 = vmatpush.msra.mxu0 %v600_v13  ;;  %759 = vmatpush.msrb.mxu3 %v600_v13 }
  0xcf   :  { %684 = vmatpush.msra.mxu0 %v599_v46  ;;  %760 = vmatpush.msrb.mxu3 %v599_v46 }
  0xd1   :  { %685 = vmatpush.msra.mxu0 %v598_v51  ;;  %761 = vmatpush.msrb.mxu3 %v598_v51 }
  0xd3   :  { %686 = vmatpush.msra.mxu0 %v597_v54  ;;  %762 = vmatpush.msrb.mxu3 %v597_v54 }
 0x116   :  { %v197_v18 = vpop.f32.mrf.mxu1 }
 0x117   :  { %v771_v47 = vcvt.f32.s32 %v197_v18 }
 0x119   :  { %206 = vst.msk [vmem:[%s1301_s2] sm:$0xff] %vm205_vm14, %v771_v47 }
 0x11e   :  { %v200_v55 = vpop.f32.mrf.mxu1 }
 0x11f   :  { %v774_v56 = vcvt.f32.s32 %v200_v55 }
 0x121   :  { %208 = vst.msk [vmem:[%s1301_s2 + $0x8] sm:$0x1] %vm207_vm5, %v774_v56 }
 0x126   :  { %v656_v7 = vpop.f32.mrf.mxu1 }
 0x127   :  { %746 = vmatmul.msk.f32.vlgmr.msra.gmra.mxu0 %vm169_vm1, %v656_v7 }
 0x12c   :  { %v525_v57 = vpop.f32.mrf.mxu2 }
 0x12d   :  { %v795_v58 = vcvt.f32.s32 %v525_v57 }
 0x12f   :  { %735 = vst.msk [vmem:[%s1301_s2 + $0x20] sm:$0xff] %vm205_vm14, %v795_v58 }
 0x134   :  { %v528_v59 = vpop.f32.mrf.mxu2 }
 0x135   :  { %v798_v60 = vcvt.f32.s32 %v528_v59 }
 0x137   :  { %736 = vst.msk [vmem:[%s1301_s2 + $0x28] sm:$0x1] %vm207_vm5, %v798_v60 }
 0x13c   :  { %v659_v61 = vpop.f32.mrf.mxu2 }
 0x13d   :  { %747 = vmatmul.msk.f32.vlgmr.msrb.gmra.mxu3 %vm169_vm1, %v659_v61 }
 0x143   :  { %v362_v62 = vpop.f32.mrf.mxu3 }
 0x144   :  { %v783_v63 = vcvt.f32.s32 %v362_v62 }
 0x146   :  { %722 = vst.msk [vmem:[%s1301_s2 + $0x10] sm:$0xff] %vm205_vm14, %v783_v63 }
 0x14b   :  { %v365_v45 = vpop.f32.mrf.mxu3 }
 0x14c   :  { %v786_v1 = vcvt.f32.s32 %v365_v45 }
 0x14e   :  { %723 = vst.msk [vmem:[%s1301_s2 + $0x18] sm:$0x1] %vm207_vm5, %v786_v1 }
 0x1a4   :  { %v688_v24 = vpop.f32.mrf.mxu0 }
 0x1a5   :  { %v807_v50 = vcvt.f32.s32 %v688_v24 }
 0x1a7   :  { %748 = vst.msk [vmem:[%s1301_s2 + $0x30] sm:$0xff] %vm205_vm14, %v807_v50 }
 0x1c0   :  { %v691_v44 = vpop.f32.mrf.mxu3 }
 0x1c1   :  { %v810_v49 = vcvt.f32.s32 %v691_v44 }
 0x1c3   :  { %749 = vst.msk [vmem:[%s1301_s2 + $0x38] sm:$0x1] %vm207_vm5, %v810_v49 }
 0x1c4   :  { %703 = vsyncpa [#allocation3], 1 }

</bundles_post_ra>
